<compile_context>
chip_gen: v7x
topology: tpu7x:2x2x1
jax: 0.10.0
libtpu: 0.0.40
codegen_flags: <defaults>
</compile_context>

<pallas_src>
import functools

import jax
import jax.numpy as jnp
from jax.experimental import pallas as pl
from jax.experimental.pallas import tpu as pltpu


def _round_up(x, m):
    return ((x + m - 1) // m) * m


def _proj_kernel(x_ref, w_ref, b_ref, o_ref, *, wp):
    # x_ref: (1, Cin, L_in)      bf16 -- flattened, zero-padded NCHW plane
    # w_ref: (9, t_cout, Cin)    bf16 -- per-tap weights (tap = kh*3 + kw)
    # b_ref: (t_cout, 1)         f32
    # o_ref: (1, t_cout, L_out)       -- lane-dense "canvas" output (W-stride = wp)
    l_out = o_ref.shape[-1]
    x = x_ref[0]                                       # (Cin, L_in), single load
    acc = None
    for kh in range(3):
        for kw in range(3):
            off = kh * wp + kw                         # static 1-D tap shift
            xs = x[:, off:off + l_out]                 # (Cin, L_out)
            part = jnp.dot(w_ref[kh * 3 + kw], xs,
                           preferred_element_type=jnp.float32)
            acc = part if acc is None else acc + part
    o_ref[0] = (acc + b_ref[...]).astype(o_ref.dtype)  # f32 bias epilogue


def _vmem_budget_bytes():
    cap = None
    get_info = getattr(pltpu, "get_tpu_info", None)
    if get_info is not None:
        try:
            cap = int(get_info().vmem_capacity_bytes)
        except Exception:
            cap = None
    if cap is None or cap <= 0:
        cap = 64 * 1024 * 1024                         # conservative (v7x-sized)
    return int(min(0.8 * cap, 100 * 1024 * 1024))


def projection_forward(x_nchw, weight_oihw, bias_o):
    """Projection.forward: Conv2d(in_chs, out_chs, 3, padding=1) on NCHW."""
    N, Cin, H, W = x_nchw.shape
    Cout = weight_oihw.shape[0]
    out_dtype = x_nchw.dtype
    out_isize = jnp.dtype(out_dtype).itemsize

    Hp, Wp = H + 2, W + 2
    # Output "canvas": position p = h*Wp + w (h<H, w<W are the valid ones);
    # rounded up to a lane multiple -> unmasked full-width stores.
    l_out = _round_up(H * Wp, 128)
    # Flattened input plane, tail-padded so every tap slice stays in bounds.
    l_in = _round_up(l_out + 2 * Wp + 2, 128)

    # ---- wrapper-side prep (only ~1x extra activation HBM traffic) ---------
    x_pad = jnp.pad(x_nchw.astype(jnp.bfloat16), ((0, 0), (0, 0), (1, 1), (1, 1)))
    x_flat = jnp.pad(x_pad.reshape(N, Cin, Hp * Wp),
                     ((0, 0), (0, 0), (0, l_in - Hp * Wp)))

    cout_pad = _round_up(Cout, 16)                     # bf16 sublane quantum
    w9 = jnp.transpose(weight_oihw, (2, 3, 0, 1)).reshape(9, Cout, Cin)
    w9 = jnp.pad(w9, ((0, 0), (0, cout_pad - Cout), (0, 0))).astype(jnp.bfloat16)
    b2d = jnp.pad(bias_o, (0, cout_pad - Cout)).reshape(cout_pad, 1).astype(jnp.float32)

    # ---- per-generation VMEM budget and Cout tiling ------------------------
    budget = _vmem_budget_bytes()
    x_bytes = 2 * Cin * l_in * 2                       # double-buffered plane

    def block_bytes(t):
        return (x_bytes
                + 2 * 9 * t * Cin * 2                  # weight blocks (x2 bufs)
                + 2 * t * 4                            # bias blocks
                + 2 * t * l_out * out_isize            # output blocks
                + 2 * t * l_out * 4)                   # implicit f32 accumulator

    cands = sorted((t for t in range(16, min(cout_pad, 512) + 1, 16)
                    if cout_pad % t == 0), reverse=True)
    t_cout = cands[-1]                                 # fallback: smallest tile
    for t in cands:
        if block_bytes(t) <= budget:
            t_cout = t
            break
    # Guarantee >= 2 grid steps (v7x: 2 TensorCores + pipeline overlap).
    if N * (cout_pad // t_cout) < 2:
        smaller = [t for t in cands if t < t_cout]
        if smaller:
            t_cout = smaller[0]

    vmem_limit = int(min(max(block_bytes(t_cout) * 5 // 4, budget),
                         127 * 1024 * 1024))

    grid = (cout_pad // t_cout, N)    # weights outermost -> fetched once per tile

    out_canvas = pl.pallas_call(
        functools.partial(_proj_kernel, wp=Wp),
        out_shape=jax.ShapeDtypeStruct((N, cout_pad, l_out), out_dtype),
        grid=grid,
        in_specs=[
            pl.BlockSpec((1, Cin, l_in), lambda co, n: (n, 0, 0)),
            pl.BlockSpec((9, t_cout, Cin), lambda co, n: (0, co, 0)),
            pl.BlockSpec((t_cout, 1), lambda co, n: (co, 0)),
        ],
        out_specs=pl.BlockSpec((1, t_cout, l_out), lambda co, n: (n, co, 0)),
        compiler_params=pltpu.CompilerParams(
            dimension_semantics=("parallel", "parallel"),
            vmem_limit_bytes=vmem_limit,
        ),
    )(x_flat, w9, b2d)

    # Crop the valid window: canvas index p = h*Wp + w.
    out = out_canvas[:, :Cout, :H * Wp].reshape(N, Cout, H, Wp)[:, :, :, :W]
    return out


if __name__ == "__main__":
    key = jax.random.PRNGKey(0)
    kx, kw, kb = jax.random.split(key, 3)

    N, Cin, Cout, H, W = 2, 4, 8, 16, 16

    x = jax.random.normal(kx, (N, Cin, H, W), dtype=jnp.float32)
    # Deterministic synthetic parameters (same shapes as nn.Conv2d(in, out, 3)).
    fan_in = Cin * 3 * 3
    bound = 1.0 / (fan_in ** 0.5)
    weight = jax.random.uniform(kw, (Cout, Cin, 3, 3), jnp.float32, -bound, bound)
    bias = jax.random.uniform(kb, (Cout,), jnp.float32, -bound, bound)

    proj = jax.jit(projection_forward)
    out = jax.block_until_ready(proj(x, weight, bias))

    # Reference on the same bf16-rounded operands (the kernel feeds bf16 MXU
    # operands with f32 accumulation), f32 accumulation throughout.
    xr = x.astype(jnp.bfloat16).astype(jnp.float32)
    wr = weight.astype(jnp.bfloat16).astype(jnp.float32)
    ref = jax.lax.conv_general_dilated(
        xr, wr, window_strides=(1, 1), padding=((1, 1), (1, 1)),
        dimension_numbers=("NCHW", "OIHW", "NCHW"),
        precision=jax.lax.Precision.HIGHEST,
    ) + bias.reshape(1, Cout, 1, 1)

    assert out.shape == (N, Cout, H, W)
    assert jnp.allclose(out, ref, atol=1e-2, rtol=1e-2)

    print("KERNEL_OK")
</pallas_src>

<mosaic_0001>
module attributes {stable_mosaic.version = 11 : i64} {
  func.func @_proj_kernel(%arg0: i32, %arg1: i32, %arg2: memref<1x4x512xbf16, #tpu.memory_space<vmem>>, %arg3: memref<9x16x4xbf16, #tpu.memory_space<vmem>>, %arg4: memref<16x1xf32, #tpu.memory_space<vmem>>, %arg5: memref<1x16x384xf32, #tpu.memory_space<vmem>>) attributes {dimension_semantics = [#tpu.dimension_semantics<parallel>, #tpu.dimension_semantics<parallel>], iteration_bounds = array<i64: 1, 2>, scalar_prefetch = 0 : i64, scratch_operands = 0 : i64, tpu.core_type = #tpu.core_type<tc>, window_params = [{transform_indices = @transform_0, window_bounds = array<i64: 1, 4, 512>}, {transform_indices = @transform_1, window_bounds = array<i64: 9, 16, 4>}, {transform_indices = @transform_2, window_bounds = array<i64: 16, 1>}, {transform_indices = @transform_3, window_bounds = array<i64: 1, 16, 384>}]} {
    %c0 = arith.constant 0 : index
    %c0_0 = arith.constant 0 : index
    %c0_1 = arith.constant 0 : index
    %0 = vector.load %arg2[%c0, %c0_0, %c0_1] : memref<1x4x512xbf16, #tpu.memory_space<vmem>>, vector<1x4x512xbf16>
    %1 = vector.shape_cast %0 : vector<1x4x512xbf16> to vector<4x512xbf16>
    %2 = vector.extract_strided_slice %1 {offsets = [0, 0], sizes = [4, 384], strides = [1, 1]} : vector<4x512xbf16> to vector<4x384xbf16>
    %c0_2 = arith.constant 0 : index
    %c0_3 = arith.constant 0 : index
    %c0_4 = arith.constant 0 : index
    %3 = vector.load %arg3[%c0_2, %c0_3, %c0_4] : memref<9x16x4xbf16, #tpu.memory_space<vmem>>, vector<1x16x4xbf16>
    %4 = vector.shape_cast %3 : vector<1x16x4xbf16> to vector<16x4xbf16>
    %cst = arith.constant dense<0.000000e+00> : vector<16x384xf32>
    %5 = tpu.matmul %4, %2, %cst {dimension_numbers = #tpu.dot_dimension_numbers<[1], [0], [0], [1], [0, 0, 1, 1], [], []>} : vector<16x4xbf16>, vector<4x384xbf16>, vector<16x384xf32> -> vector<16x384xf32>
    %6 = vector.extract_strided_slice %1 {offsets = [0, 1], sizes = [4, 384], strides = [1, 1]} : vector<4x512xbf16> to vector<4x384xbf16>
    %c1 = arith.constant 1 : index
    %c0_5 = arith.constant 0 : index
    %c0_6 = arith.constant 0 : index
    %7 = vector.load %arg3[%c1, %c0_5, %c0_6] : memref<9x16x4xbf16, #tpu.memory_space<vmem>>, vector<1x16x4xbf16>
    %8 = vector.shape_cast %7 : vector<1x16x4xbf16> to vector<16x4xbf16>
    %cst_7 = arith.constant dense<0.000000e+00> : vector<16x384xf32>
    %9 = tpu.matmul %8, %6, %cst_7 {dimension_numbers = #tpu.dot_dimension_numbers<[1], [0], [0], [1], [0, 0, 1, 1], [], []>} : vector<16x4xbf16>, vector<4x384xbf16>, vector<16x384xf32> -> vector<16x384xf32>
    %10 = arith.addf %5, %9 : vector<16x384xf32>
    %11 = vector.extract_strided_slice %1 {offsets = [0, 2], sizes = [4, 384], strides = [1, 1]} : vector<4x512xbf16> to vector<4x384xbf16>
    %c2 = arith.constant 2 : index
    %c0_8 = arith.constant 0 : index
    %c0_9 = arith.constant 0 : index
    %12 = vector.load %arg3[%c2, %c0_8, %c0_9] : memref<9x16x4xbf16, #tpu.memory_space<vmem>>, vector<1x16x4xbf16>
    %13 = vector.shape_cast %12 : vector<1x16x4xbf16> to vector<16x4xbf16>
    %cst_10 = arith.constant dense<0.000000e+00> : vector<16x384xf32>
    %14 = tpu.matmul %13, %11, %cst_10 {dimension_numbers = #tpu.dot_dimension_numbers<[1], [0], [0], [1], [0, 0, 1, 1], [], []>} : vector<16x4xbf16>, vector<4x384xbf16>, vector<16x384xf32> -> vector<16x384xf32>
    %15 = arith.addf %10, %14 : vector<16x384xf32>
    %16 = vector.extract_strided_slice %1 {offsets = [0, 18], sizes = [4, 384], strides = [1, 1]} : vector<4x512xbf16> to vector<4x384xbf16>
    %c3 = arith.constant 3 : index
    %c0_11 = arith.constant 0 : index
    %c0_12 = arith.constant 0 : index
    %17 = vector.load %arg3[%c3, %c0_11, %c0_12] : memref<9x16x4xbf16, #tpu.memory_space<vmem>>, vector<1x16x4xbf16>
    %18 = vector.shape_cast %17 : vector<1x16x4xbf16> to vector<16x4xbf16>
    %cst_13 = arith.constant dense<0.000000e+00> : vector<16x384xf32>
    %19 = tpu.matmul %18, %16, %cst_13 {dimension_numbers = #tpu.dot_dimension_numbers<[1], [0], [0], [1], [0, 0, 1, 1], [], []>} : vector<16x4xbf16>, vector<4x384xbf16>, vector<16x384xf32> -> vector<16x384xf32>
    %20 = arith.addf %15, %19 : vector<16x384xf32>
    %21 = vector.extract_strided_slice %1 {offsets = [0, 19], sizes = [4, 384], strides = [1, 1]} : vector<4x512xbf16> to vector<4x384xbf16>
    %c4 = arith.constant 4 : index
    %c0_14 = arith.constant 0 : index
    %c0_15 = arith.constant 0 : index
    %22 = vector.load %arg3[%c4, %c0_14, %c0_15] : memref<9x16x4xbf16, #tpu.memory_space<vmem>>, vector<1x16x4xbf16>
    %23 = vector.shape_cast %22 : vector<1x16x4xbf16> to vector<16x4xbf16>
    %cst_16 = arith.constant dense<0.000000e+00> : vector<16x384xf32>
    %24 = tpu.matmul %23, %21, %cst_16 {dimension_numbers = #tpu.dot_dimension_numbers<[1], [0], [0], [1], [0, 0, 1, 1], [], []>} : vector<16x4xbf16>, vector<4x384xbf16>, vector<16x384xf32> -> vector<16x384xf32>
    %25 = arith.addf %20, %24 : vector<16x384xf32>
    %26 = vector.extract_strided_slice %1 {offsets = [0, 20], sizes = [4, 384], strides = [1, 1]} : vector<4x512xbf16> to vector<4x384xbf16>
    %c5 = arith.constant 5 : index
    %c0_17 = arith.constant 0 : index
    %c0_18 = arith.constant 0 : index
    %27 = vector.load %arg3[%c5, %c0_17, %c0_18] : memref<9x16x4xbf16, #tpu.memory_space<vmem>>, vector<1x16x4xbf16>
    %28 = vector.shape_cast %27 : vector<1x16x4xbf16> to vector<16x4xbf16>
    %cst_19 = arith.constant dense<0.000000e+00> : vector<16x384xf32>
    %29 = tpu.matmul %28, %26, %cst_19 {dimension_numbers = #tpu.dot_dimension_numbers<[1], [0], [0], [1], [0, 0, 1, 1], [], []>} : vector<16x4xbf16>, vector<4x384xbf16>, vector<16x384xf32> -> vector<16x384xf32>
    %30 = arith.addf %25, %29 : vector<16x384xf32>
    %31 = vector.extract_strided_slice %1 {offsets = [0, 36], sizes = [4, 384], strides = [1, 1]} : vector<4x512xbf16> to vector<4x384xbf16>
    %c6 = arith.constant 6 : index
    %c0_20 = arith.constant 0 : index
    %c0_21 = arith.constant 0 : index
    %32 = vector.load %arg3[%c6, %c0_20, %c0_21] : memref<9x16x4xbf16, #tpu.memory_space<vmem>>, vector<1x16x4xbf16>
    %33 = vector.shape_cast %32 : vector<1x16x4xbf16> to vector<16x4xbf16>
    %cst_22 = arith.constant dense<0.000000e+00> : vector<16x384xf32>
    %34 = tpu.matmul %33, %31, %cst_22 {dimension_numbers = #tpu.dot_dimension_numbers<[1], [0], [0], [1], [0, 0, 1, 1], [], []>} : vector<16x4xbf16>, vector<4x384xbf16>, vector<16x384xf32> -> vector<16x384xf32>
    %35 = arith.addf %30, %34 : vector<16x384xf32>
    %36 = vector.extract_strided_slice %1 {offsets = [0, 37], sizes = [4, 384], strides = [1, 1]} : vector<4x512xbf16> to vector<4x384xbf16>
    %c7 = arith.constant 7 : index
    %c0_23 = arith.constant 0 : index
    %c0_24 = arith.constant 0 : index
    %37 = vector.load %arg3[%c7, %c0_23, %c0_24] : memref<9x16x4xbf16, #tpu.memory_space<vmem>>, vector<1x16x4xbf16>
    %38 = vector.shape_cast %37 : vector<1x16x4xbf16> to vector<16x4xbf16>
    %cst_25 = arith.constant dense<0.000000e+00> : vector<16x384xf32>
    %39 = tpu.matmul %38, %36, %cst_25 {dimension_numbers = #tpu.dot_dimension_numbers<[1], [0], [0], [1], [0, 0, 1, 1], [], []>} : vector<16x4xbf16>, vector<4x384xbf16>, vector<16x384xf32> -> vector<16x384xf32>
    %40 = arith.addf %35, %39 : vector<16x384xf32>
    %41 = vector.extract_strided_slice %1 {offsets = [0, 38], sizes = [4, 384], strides = [1, 1]} : vector<4x512xbf16> to vector<4x384xbf16>
    %c8 = arith.constant 8 : index
    %c0_26 = arith.constant 0 : index
    %c0_27 = arith.constant 0 : index
    %42 = vector.load %arg3[%c8, %c0_26, %c0_27] : memref<9x16x4xbf16, #tpu.memory_space<vmem>>, vector<1x16x4xbf16>
    %43 = vector.shape_cast %42 : vector<1x16x4xbf16> to vector<16x4xbf16>
    %cst_28 = arith.constant dense<0.000000e+00> : vector<16x384xf32>
    %44 = tpu.matmul %43, %41, %cst_28 {dimension_numbers = #tpu.dot_dimension_numbers<[1], [0], [0], [1], [0, 0, 1, 1], [], []>} : vector<16x4xbf16>, vector<4x384xbf16>, vector<16x384xf32> -> vector<16x384xf32>
    %45 = arith.addf %40, %44 : vector<16x384xf32>
    %c0_29 = arith.constant 0 : index
    %c0_30 = arith.constant 0 : index
    %46 = vector.load %arg4[%c0_29, %c0_30] : memref<16x1xf32, #tpu.memory_space<vmem>>, vector<16x1xf32>
    %47 = vector.broadcast %46 : vector<16x1xf32> to vector<16x384xf32>
    %48 = arith.addf %45, %47 : vector<16x384xf32>
    %c0_31 = arith.constant 0 : index
    %c0_32 = arith.constant 0 : index
    %c0_33 = arith.constant 0 : index
    %49 = vector.load %arg5[%c0_31, %c0_32, %c0_33] : memref<1x16x384xf32, #tpu.memory_space<vmem>>, vector<1x16x384xf32>
    %50 = vector.shape_cast %49 : vector<1x16x384xf32> to vector<16x384xf32>
    %51 = vector.shape_cast %48 : vector<16x384xf32> to vector<1x16x384xf32>
    tpu.vector_store %arg5[%c0_31, %c0_32, %c0_33], %51 {strides = array<i32>} : memref<1x16x384xf32, #tpu.memory_space<vmem>>, vector<1x16x384xf32>,
    return
  }
  func.func @transform_0(%arg0: i32, %arg1: i32) -> (i32, i32, i32) {
    %c0_i32 = arith.constant 0 : i32
    %c0_i32_0 = arith.constant 0 : i32
    %c0_i32_1 = arith.constant 0 : i32
    return %arg1, %c0_i32, %c0_i32_0 : i32, i32, i32
  }
  func.func @transform_1(%arg0: i32, %arg1: i32) -> (i32, i32, i32) {
    %c0_i32 = arith.constant 0 : i32
    %c0_i32_0 = arith.constant 0 : i32
    %c0_i32_1 = arith.constant 0 : i32
    return %c0_i32, %arg0, %c0_i32_0 : i32, i32, i32
  }
  func.func @transform_2(%arg0: i32, %arg1: i32) -> (i32, i32) {
    %c0_i32 = arith.constant 0 : i32
    %c0_i32_0 = arith.constant 0 : i32
    return %arg0, %c0_i32 : i32, i32
  }
  func.func @transform_3(%arg0: i32, %arg1: i32) -> (i32, i32, i32) {
    %c0_i32 = arith.constant 0 : i32
    %c0_i32_0 = arith.constant 0 : i32
    return %arg1, %arg0, %c0_i32 : i32, i32, i32
  }
}

</mosaic_0001>

<bundles_post_ra>
// kernel: projection_forward.1
= control target key start
LH: loop header
LB: loop body
LE: loop exit
PB: predicated region body
PF: predicated region fallthrough
CT: control target
= control target key end

     0   :  { %s1750_s12 = smov 0   ;;  %s1752_s13 = smov 0   ;;  %s1953_s0 = inlined_call_operand.vmem [shape: bf16[2,4,512], index: 0, kind: input, shape index: {}]   ;;  %s1954_s1 = inlined_call_operand.vmem [shape: bf16[9,16,4], index: 1, kind: input, shape index: {}]   ;;  %s1955_s2 = inlined_call_operand.vmem [shape: f32[16,1], index: 2, kind: input, shape index: {}]   ;;  %s1956_s3 = inlined_call_operand.vmem [shape: f32[2,16,384], index: 3, kind: output, shape index: {}]  }
   0x1   :  { %s1754_s14 = smov 0  }
   0x2 LB: > { %s22_s15 = sadd.s32 1, %s1712_s13  ;;  %p1482_p0 = scmp.ge.s32.totalorder %s1716_s14, 1  ;;  %s1716_s14 = sphi %s1754_s14, %s13_s14   ;;  %s1712_s13 = sphi %s1752_s13, %s1958_s13   ;;  %s1708_s12 = sphi %s1750_s12, %s1957_s12  }
   0x3   : > { %p23_p1 = scmp.ge.s32.totalorder %s22_s15, 2  ;;  %p173_p2 = scmp.lt.s32.totalorder %s1716_s14, 3 }
   0x5   : > { %s1960_s15 = smov (%p23_p1, %s22_s15), 0  ;;  %p174_p3 = pnand %p1482_p0, %p173_p2 }
   0x6   : > { %p212_p4 = scmp.lt.s32.totalorder (!%p174_p3), %s1708_s12, 1  ;;  %v257_v0 = vlaneseq (!%p174_p3)  ;;  %v1718_v1 = vmov (!%p174_p3), 1983009808   ;;  %v1719_v5 = vmov (!%p174_p3), 0   ;;  %v1720_v10 = vmov (!%p174_p3), 0.0   ;;  %s1721_s20 = smov (!%p174_p3), 127  }
   0x7   : > { %177 = sbr.rel (%p174_p3) target bundleno = 458 (0x1ca), region = 32  ;;  %v255_v2 = vunpack.c.l.s4 (!%p174_p3), %v1718_v1  ;;  %328 = vmatprep.mubr.bf16.mxu0 (!%p174_p3), %v1719_v5  ;;  %1682 = vset.pattern.permute.xlu0 (!%p174_p3), %v1719_v5  ;;  %vm1722_vm0 = vmmov (!%p174_p3), 0   ;;  %s1723_s21 = smov (!%p174_p3), 126   ;;  %v1335_v14 = vld [vmem:[%s1955_s2] sm:$0xff] (!%p174_p3)  ;;  %v1336_v15 = vld [vmem:[%s1955_s2 + $0x8] sm:$0xff] (!%p174_p3)  ;;  %vm278_vm1 = vcmask (!%p174_p3), 1039360  }
   0x8   : > { %v258_v3 = vshrl.u32 (!%p174_p3), %v257_v0, 7  ;;  %1683 = vset.pattern.permute.xlu1 (!%p174_p3), %v1719_v5  ;;  %1559 = vmatprep.subr.bf16.mxu1 (!%p174_p3), %v1720_v10  ;;  %s1724_s22 = smov (!%p174_p3), 110   ;;  %s1725_s23 = smov (!%p174_p3), 109   ;;  %vm286_vm2 = vcmask (!%p174_p3), 1041408   ;;  %v1685_v22 = vld [vmem:[%s1954_s1 + $0x8] sm:$0xff] (!%p174_p3)   ;;  %vm282_vm3 = vcmask (!%p174_p3), 31744  }
   0x9   : > { %v256_v4 = vunpack.c.0.s8 (!%p174_p3), %v255_v2  ;;  %1561 = vmatprep.mubr.msk.bf16.mxu1 (!%p174_p3), %vm1722_vm0, %v1720_v10  ;;  %s1726_s24 = smov (!%p174_p3), 108   ;;  %s1727_s25 = smov (!%p174_p3), 92   ;;  %vm497_vm4 = vcmask (!%p174_p3), 1031168   ;;  %v1686_v35 = vld [vmem:[%s1954_s1] sm:$0xff] (!%p174_p3)   ;;  %vm619_vm5 = vcmask (!%p174_p3), 900096   ;;  %v1687_v48 = vld [vmem:[%s1954_s1 + $0x10] sm:$0xff] (!%p174_p3)  }
   0xa   : > { %s1728_s26 = smov (!%p174_p3), 91   ;;  %s1729_s27 = smov (!%p174_p3), 90   ;;  %vm741_vm6 = vcmask (!%p174_p3), 891904   ;;  %v1688_v57 = vld [vmem:[%s1954_s1 + $0x18] sm:$0xff] (!%p174_p3)   ;;  %vm863_vm7 = vcmask (!%p174_p3), 883712   ;;  %v1689_v2 = vld [vmem:[%s1954_s1 + $0x20] sm:$0xff] (!%p174_p3)  }
   0xb   : > { %v259_v6 = vsub.s32 (!%p174_p3), %v256_v4, %v258_v3  ;;  %vm985_vm8 = vcmask (!%p174_p3), 752640   ;;  %vm1107_vm9 = vcmask (!%p174_p3), 744448   ;;  %vm1229_vm10 = vcmask (!%p174_p3), 736256  }
   0xe   : > { %s1962_s12 = smov (!%p212_p4, %s1708_s12), 1 }
   0xf   : > { %s1540_s16 = sshll.u32 %s1962_s12, 3 }
  0x10   : > { %s216_s19 = scalar_lea.vmem %s1953_s0, %s1540_s16 }
  0x11   : > { %v241_v7 = vld [vmem:[%s216_s19] sm:$0xff] }
  0x12   : > { %v1777_v8 = vrot.slane %v241_v7, %v259_v6  ;;  %v253_v9 = vcombine.high %v241_v7, %v241_v7 }
  0x14   : > { %270 = vrot.lane.b32.xlu0 %v1777_v8, %s1721_s20  ;;  %v268_v11 = vcombine.high %v1777_v8, %v1777_v8  ;;  %v1783_v12 = vrot.slane %v253_v9, %v259_v6  ;;  %v389_v25 = vsel %vm286_vm2, %v1777_v8, 0 }
  0x16   : > { %274 = vrot.lane.b32.xlu1 %v1783_v12, %s1721_s20  ;;  %v269_v13 = vcombine.high %v1783_v12, %v1783_v12  ;;  %v395_v33 = vsel %vm286_vm2, %v1783_v12, 0 }
  0x18   : > { %272 = vrot.lane.b32.xlu0 %v268_v11, %s1721_s20 }
  0x1a   : > { %489 = vrot.lane.b32.xlu1 %v1777_v8, %s1723_s21 }
  0x1c   : > { %491 = vrot.lane.b32.xlu0 %v268_v11, %s1723_s21 }
  0x1e   : > { %493 = vrot.lane.b32.xlu1 %v1783_v12, %s1723_s21 }
  0x20   : > { %276 = vrot.lane.b32.xlu0 %v269_v13, %s1721_s20 }
  0x22   : > { %611 = vrot.lane.b32.xlu1 %v1777_v8, %s1724_s22 }
  0x24   : > { %613 = vrot.lane.b32.xlu0 %v268_v11, %s1724_s22 }
  0x26   : > { %615 = vrot.lane.b32.xlu1 %v1783_v12, %s1724_s22 }
  0x28   : > { %495 = vrot.lane.b32.xlu0 %v269_v13, %s1723_s21 }
  0x2a   : > { %733 = vrot.lane.b32.xlu1 %v1777_v8, %s1725_s23 }
  0x2c   : > { %735 = vrot.lane.b32.xlu0 %v268_v11, %s1725_s23 }
  0x2e   : > { %737 = vrot.lane.b32.xlu1 %v1783_v12, %s1725_s23 }
  0x30   : > { %617 = vrot.lane.b32.xlu0 %v269_v13, %s1724_s22 }
  0x32   : > { %855 = vrot.lane.b32.xlu1 %v1777_v8, %s1726_s24 }
  0x34   : > { %857 = vrot.lane.b32.xlu0 %v268_v11, %s1726_s24 }
  0x36   : > { %859 = vrot.lane.b32.xlu1 %v1783_v12, %s1726_s24 }
  0x38   : > { %739 = vrot.lane.b32.xlu0 %v269_v13, %s1725_s23 }
  0x3a   : > { %861 = vrot.lane.b32.xlu1 %v269_v13, %s1726_s24 }
  0x3c   : > { %977 = vrot.lane.b32.xlu0 %v1777_v8, %s1727_s25 }
  0x3e   : > { %979 = vrot.lane.b32.xlu1 %v268_v11, %s1727_s25 }
  0x40   : > { %981 = vrot.lane.b32.xlu0 %v1783_v12, %s1727_s25 }
  0x42   : > { %983 = vrot.lane.b32.xlu1 %v269_v13, %s1727_s25 }
  0x44   : > { %1099 = vrot.lane.b32.xlu0 %v1777_v8, %s1728_s26 }
  0x46   : > { %1101 = vrot.lane.b32.xlu1 %v268_v11, %s1728_s26 }
  0x48   : > { %1103 = vrot.lane.b32.xlu0 %v1783_v12, %s1728_s26 }
  0x4a   : > { %1105 = vrot.lane.b32.xlu1 %v269_v13, %s1728_s26 }
  0x4c   : > { %1225 = vrot.lane.b32.xlu0 %v1783_v12, %s1729_s27  ;;  %v1690_v12 = vld [vmem:[%s1954_s1 + $0x28] sm:$0xff]  }
  0x4e   : > { %1227 = vrot.lane.b32.xlu1 %v269_v13, %s1729_s27 }
  0x50   : > { %1221 = vrot.lane.b32.xlu0 %v1777_v8, %s1729_s27 }
  0x52   : > { %1223 = vrot.lane.b32.xlu1 %v268_v11, %s1729_s27  ;;  %s1645_s27 = smul.u32 48, %s1962_s12 }
  0x54   : > { %1339 = vperm.xlu0 %1682, %v1335_v14   ;;  %s238_s30 = scalar_lea.vmem %s1956_s3, %s1645_s27 }
  0x56   : > { %1344 = vperm.xlu1 %1683, %v1336_v15  }
  0x86   : > { %v271_v16 = vpop.permute.xlu0 %270 }
  0x88   : > { %v275_v17 = vpop.permute.xlu1 %274 }
  0x8a   : > { %v273_v18 = vpop.permute.xlu0 %272 }
  0x8b   : > { %v280_v19 = vsel %vm278_vm1, %v273_v18, %v275_v17  ;;  %v279_v20 = vsel %vm278_vm1, %v271_v16, %v273_v18 }
  0x8c   : > { %1489 = vmatprep.subr.msk.bf16.mxu0 %vm286_vm2, %v280_v19  ;;  %v288_v21 = vsel %vm286_vm2, %v279_v20, 0  ;;  %v490_v23 = vpop.permute.xlu1 %489  ;;  %v1691_v19 = vld [vmem:[%s1954_s1 + $0x30] sm:$0xff]  }
  0x8d   : > { %297 = vmatpush1.bf16.msra.mxu0 %v288_v21 }
  0x8e   : > { %v492_v24 = vpop.permute.xlu0 %491  ;;  %1493 = vmatprep.subr.msk.bf16.mxu0 %vm286_vm2, %v268_v11 }
  0x8f   : > { %v498_v34 = vsel %vm497_vm4, %v490_v23, %v492_v24 }
  0x90   : > { %1490 = vmatmul.mubr.msk.bf16.vlgmr.msra.gmra.mrb[0].mxu0 %vm282_vm3, %v1685_v22  ;;  %v494_v26 = vpop.permute.xlu1 %493  ;;  %v505_v37 = vsel %vm286_vm2, %v498_v34, 0 }
  0x91   : > { %398 = vmatpush1.bf16.msra.mxu0 %v389_v25  ;;  %v499_v27 = vsel %vm497_vm4, %v492_v24, %v494_v26  ;;  %429 = vmatprep.mubr.bf16.mxu0 %v1719_v5 }
  0x92   : > { %v277_v28 = vpop.permute.xlu0 %276  ;;  %1499 = vmatprep.subr.msk.bf16.mxu0 %vm286_vm2, %v499_v27  ;;  %v1692_v27 = vld [vmem:[%s1954_s1 + $0x38] sm:$0xff]  }
  0x93   : > { %v281_v29 = vsel %vm278_vm1, %v275_v17, %v277_v28 }
  0x94   : > { %v294_v30 = vsel %vm286_vm2, %v281_v29, 0  ;;  %v612_v31 = vpop.permute.xlu1 %611 }
  0x95   : > { %1560 = vmatpush3.bf16.msra.mxu1 %v294_v30  ;;  %v1693_v30 = vld [vmem:[%s1954_s1 + $0x40] sm:$0xff]  }
  0x96   : > { %v614_v32 = vpop.permute.xlu0 %613  ;;  %1565 = vmatprep.subr.bf16.mxu1 %v1720_v10 }
  0x97   : > { %v620_v46 = vsel %vm619_vm5, %v612_v31, %v614_v32 }
  0x98   : > { %1562 = vmatmul.mubr.msk.bf16.vlgmr.msra.gmra.mrb[0].mxu1 %vm282_vm3, %v1685_v22  ;;  %v616_v36 = vpop.permute.xlu1 %615  ;;  %v627_v50 = vsel %vm286_vm2, %v620_v46, 0 }
  0x99   : > { %1566 = vmatpush3.bf16.msra.mxu1 %v395_v33  ;;  %1567 = vmatprep.mubr.msk.bf16.mxu1 %vm1722_vm0, %v1720_v10  ;;  %v621_v40 = vsel %vm619_vm5, %v614_v32, %v616_v36 }
  0x9a   : > { %v496_v38 = vpop.permute.xlu0 %495  ;;  %1571 = vmatprep.subr.bf16.mxu1 %v1720_v10 }
  0x9b   : > { %v500_v39 = vsel %vm497_vm4, %v494_v26, %v496_v38 }
  0x9c   : > { %1494 = vmatmul.mubr.msk.bf16.vlgmr.msra.gmra.mrb[0].mxu0 %vm282_vm3, %v1686_v35  ;;  %v734_v41 = vpop.permute.xlu1 %733  ;;  %v511_v42 = vsel %vm286_vm2, %v500_v39, 0 }
  0x9d   : > { %514 = vmatpush1.bf16.msra.mxu0 %v505_v37  ;;  %545 = vmatprep.mubr.bf16.mxu0 %v1719_v5 }
  0x9e   : > { %v736_v43 = vpop.permute.xlu0 %735  ;;  %1505 = vmatprep.subr.msk.bf16.mxu0 %vm286_vm2, %v621_v40 }
  0x9f   : > { %v742_v61 = vsel %vm741_vm6, %v734_v41, %v736_v43 }
  0xa0   : > { %1568 = vmatmul.mubr.msk.bf16.vlgmr.msra.gmra.mrb[4].mxu1 %vm282_vm3, %v1686_v35  ;;  %v738_v44 = vpop.permute.xlu1 %737  ;;  %v749_v63 = vsel %vm286_vm2, %v742_v61, 0 }
  0xa1   : > { %1572 = vmatpush3.bf16.msra.mxu1 %v511_v42  ;;  %1573 = vmatprep.mubr.msk.bf16.mxu1 %vm1722_vm0, %v1720_v10  ;;  %v743_v53 = vsel %vm741_vm6, %v736_v43, %v738_v44 }
  0xa2   : > { %v618_v45 = vpop.permute.xlu0 %617  ;;  %1577 = vmatprep.subr.bf16.mxu1 %v1720_v10 }
  0xa3   : > { %v622_v47 = vsel %vm619_vm5, %v616_v36, %v618_v45 }
  0xa4   : > { %v856_v49 = vpop.permute.xlu1 %855  ;;  %v633_v51 = vsel %vm286_vm2, %v622_v47, 0 }
  0xa6   : > { %v858_v52 = vpop.permute.xlu0 %857 }
  0xa7   : > { %v864_v9 = vsel %vm863_vm7, %v856_v49, %v858_v52 }
  0xa8   : > { %1500 = vmatmul.mubr.msk.bf16.vlgmr.msra.gmra.mrb[0].mxu0 %vm282_vm3, %v1687_v48  ;;  %1574 = vmatmul.mubr.msk.bf16.vlgmr.msra.gmra.mrb[8].mxu1 %vm282_vm3, %v1687_v48  ;;  %v860_v54 = vpop.permute.xlu1 %859  ;;  %v871_v13 = vsel %vm286_vm2, %v864_v9, 0 }
  0xa9   : > { %636 = vmatpush1.bf16.msra.mxu0 %v627_v50  ;;  %1578 = vmatpush3.bf16.msra.mxu1 %v633_v51  ;;  %v865_v0 = vsel %vm863_vm7, %v858_v52, %v860_v54 }
  0xaa   : > { %1579 = vmatprep.mubr.msk.bf16.mxu1 %vm1722_vm0, %v1720_v10  ;;  %v740_v55 = vpop.permute.xlu0 %739  ;;  %667 = vmatprep.mubr.bf16.mxu0 %v1719_v5 }
  0xab   : > { %v744_v56 = vsel %vm741_vm6, %v738_v44, %v740_v55  ;;  %1511 = vmatprep.subr.msk.bf16.mxu0 %vm286_vm2, %v743_v53  ;;  %1583 = vmatprep.subr.bf16.mxu1 %v1720_v10 }
  0xac   : > { %v862_v58 = vpop.permute.xlu1 %861  ;;  %v755_v59 = vsel %vm286_vm2, %v744_v56, 0 }
  0xad   : > { %v866_v1 = vsel %vm863_vm7, %v860_v54, %v862_v58 }
  0xae   : > { %v978_v60 = vpop.permute.xlu0 %977  ;;  %v877_v6 = vsel %vm286_vm2, %v866_v1, 0 }
  0xb0   : > { %1580 = vmatmul.mubr.msk.bf16.vlgmr.msra.gmra.mrb[12].mxu1 %vm282_vm3, %v1688_v57  ;;  %v980_v62 = vpop.permute.xlu1 %979 }
  0xb1   : > { %1584 = vmatpush3.bf16.msra.mxu1 %v755_v59  ;;  %1585 = vmatprep.mubr.msk.bf16.mxu1 %vm1722_vm0, %v1720_v10  ;;  %v986_v21 = vsel %vm985_vm8, %v978_v60, %v980_v62 }
  0xb2   : > { %1589 = vmatprep.subr.bf16.mxu1 %v1720_v10  ;;  %v982_v4 = vpop.permute.xlu0 %981  ;;  %v993_v24 = vsel %vm286_vm2, %v986_v21, 0 }
  0xb3   : > { %v987_v15 = vsel %vm985_vm8, %v980_v62, %v982_v4 }
  0xb4   : > { %1506 = vmatmul.mubr.msk.bf16.vlgmr.msra.gmra.mrb[0].mxu0 %vm282_vm3, %v1688_v57  ;;  %v984_v3 = vpop.permute.xlu1 %983 }
  0xb5   : > { %758 = vmatpush1.bf16.msra.mxu0 %v749_v63  ;;  %789 = vmatprep.mubr.bf16.mxu0 %v1719_v5  ;;  %v988_v11 = vsel %vm985_vm8, %v982_v4, %v984_v3 }
  0xb6   : > { %1517 = vmatprep.subr.msk.bf16.mxu0 %vm286_vm2, %v865_v0  ;;  %v1100_v8 = vpop.permute.xlu0 %1099  ;;  %v999_v14 = vsel %vm286_vm2, %v988_v11, 0 }
  0xb8   : > { %1586 = vmatmul.mubr.msk.bf16.vlgmr.msra.gmra.mrb[16].mxu1 %vm282_vm3, %v1689_v2  ;;  %v1102_v7 = vpop.permute.xlu1 %1101 }
  0xb9   : > { %1590 = vmatpush3.bf16.msra.mxu1 %v877_v6  ;;  %1591 = vmatprep.mubr.msk.bf16.mxu1 %vm1722_vm0, %v1720_v10  ;;  %v1108_v29 = vsel %vm1107_vm9, %v1100_v8, %v1102_v7 }
  0xba   : > { %1595 = vmatprep.subr.bf16.mxu1 %v1720_v10  ;;  %v1104_v17 = vpop.permute.xlu0 %1103  ;;  %v1115_v32 = vsel %vm286_vm2, %v1108_v29, 0 }
  0xbb   : > { %v1109_v25 = vsel %vm1107_vm9, %v1102_v7, %v1104_v17 }
  0xbc   : > { %v1106_v16 = vpop.permute.xlu1 %1105 }
  0xbd   : > { %v1110_v18 = vsel %vm1107_vm9, %v1104_v17, %v1106_v16 }
  0xbe   : > { %v1121_v20 = vsel %vm286_vm2, %v1110_v18, 0  ;;  %v1226_v23 = vpop.permute.xlu0 %1225 }
  0xc0   : > { %1512 = vmatmul.mubr.msk.bf16.vlgmr.msra.gmra.mrb[0].mxu0 %vm282_vm3, %v1689_v2  ;;  %1592 = vmatmul.mubr.msk.bf16.vlgmr.msra.gmra.mrb[20].mxu1 %vm282_vm3, %v1690_v12  ;;  %v1228_v22 = vpop.permute.xlu1 %1227 }
  0xc1   : > { %880 = vmatpush1.bf16.msra.mxu0 %v871_v13  ;;  %1596 = vmatpush3.bf16.msra.mxu1 %v999_v14  ;;  %v1232_v26 = vsel %vm1229_vm10, %v1226_v23, %v1228_v22 }
  0xc2   : > { %1597 = vmatprep.mubr.msk.bf16.mxu1 %vm1722_vm0, %v1720_v10  ;;  %911 = vmatprep.mubr.bf16.mxu0 %v1719_v5  ;;  %v1243_v28 = vsel %vm286_vm2, %v1232_v26, 0 }
  0xc3   : > { %1523 = vmatprep.subr.msk.bf16.mxu0 %vm286_vm2, %v987_v15  ;;  %1601 = vmatprep.subr.bf16.mxu1 %v1720_v10 }
  0xc4   : > { %v1224_v31 = vpop.permute.xlu1 %1223 }
  0xc5   : > { %v1231_v33 = vsel %vm1229_vm10, %v1224_v31, %v1226_v23 }
  0xc8   : > { %1598 = vmatmul.mubr.msk.bf16.vlgmr.msra.gmra.mrb[24].mxu1 %vm282_vm3, %v1691_v19 }
  0xc9   : > { %1602 = vmatpush3.bf16.msra.mxu1 %v1121_v20  ;;  %1603 = vmatprep.mubr.msk.bf16.mxu1 %vm1722_vm0, %v1720_v10 }
  0xca   : > { %1607 = vmatprep.subr.bf16.mxu1 %v1720_v10 }
  0xcc   : > { %1518 = vmatmul.mubr.msk.bf16.vlgmr.msra.gmra.mrb[0].mxu0 %vm282_vm3, %v1690_v12 }
  0xcd   : > { %1002 = vmatpush1.bf16.msra.mxu0 %v993_v24  ;;  %1033 = vmatprep.mubr.bf16.mxu0 %v1719_v5 }
  0xce   : > { %1529 = vmatprep.subr.msk.bf16.mxu0 %vm286_vm2, %v1109_v25 }
  0xd0   : > { %1604 = vmatmul.mubr.msk.bf16.vlgmr.msra.gmra.mrb[28].mxu1 %vm282_vm3, %v1692_v27 }
  0xd1   : > { %1608 = vmatpush3.bf16.msra.mxu1 %v1243_v28  ;;  %1609 = vmatprep.mubr.msk.bf16.mxu1 %vm1722_vm0, %v1720_v10  ;;  %v1222_v10 = vpop.permute.xlu0 %1221 }
  0xd2   : > { %v1230_v34 = vsel %vm1229_vm10, %v1222_v10, %v1224_v31 }
  0xd3   : > { %v1237_v35 = vsel %vm286_vm2, %v1230_v34, 0 }
  0xd5   : > { %v1340_v20 = vpop.permute.xlu0 %1339  ;;  %v1345_v24 = vpop.permute.xlu1 %1344 }
  0xd8   : > { %1524 = vmatmul.mubr.msk.bf16.vlgmr.msra.gmra.mrb[0].mxu0 %vm282_vm3, %v1691_v19  ;;  %1610 = vmatmul.mubr.msk.bf16.vlgmr.msra.gmra.mrb[32].mxu1 %vm282_vm3, %v1693_v30 }
  0xd9   : > { %1124 = vmatpush1.bf16.msra.mxu0 %v1115_v32  ;;  %1155 = vmatprep.mubr.bf16.mxu0 %v1719_v5 }
  0xda   : > { %1535 = vmatprep.subr.msk.bf16.mxu0 %vm286_vm2, %v1231_v33 }
  0xe4   : > { %1530 = vmatmul.mubr.msk.bf16.vlgmr.msra.gmra.mrb[0].mxu0 %vm282_vm3, %v1692_v27 }
  0xe5   : > { %1246 = vmatpush1.bf16.msra.mxu0 %v1237_v35  ;;  %1277 = vmatprep.mubr.bf16.mxu0 %v1719_v5 }
  0xf0   : > { %1536 = vmatmul.mubr.msk.bf16.vlgmr.msra.gmra.mrb[0].mxu0 %vm282_vm3, %v1693_v30 }
 0x16b   : > { %v373_v36 = vpop.f32.mrb[0].mxu1 }
 0x16c   : > { %v1563_v37 = vpop.f32.mrb[1].mxu1 }
 0x16d   : > { %v376_v38 = vpop.f32.mrb[2].mxu1 }
 0x16e   : > { %v1564_v39 = vpop.f32.mrb[3].mxu1 }
 0x173   : > { %v474_v40 = vpop.f32.mrb[4].mxu1 }
 0x174   : > { %v475_v41 = vadd.f32 %v474_v40, %v373_v36  ;;  %v1569_v42 = vpop.f32.mrb[5].mxu1 }
 0x175   : > { %v477_v43 = vpop.f32.mrb[6].mxu1 }
 0x176   : > { %v478_v44 = vadd.f32 %v477_v43, %v376_v38  ;;  %v1570_v45 = vpop.f32.mrb[7].mxu1 }
 0x17b   : > { %v590_v46 = vpop.f32.mrb[8].mxu1 }
 0x17c   : > { %v599_v47 = vadd.f32 %v590_v46, %v475_v41  ;;  %v1575_v48 = vpop.f32.mrb[9].mxu1 }
 0x17d   : > { %v593_v49 = vpop.f32.mrb[10].mxu1 }
 0x17e   : > { %v602_v50 = vadd.f32 %v593_v49, %v478_v44  ;;  %v1576_v51 = vpop.f32.mrb[11].mxu1 }
 0x183   : > { %v712_v52 = vpop.f32.mrb[12].mxu1 }
 0x184   : > { %v721_v5 = vadd.f32 %v712_v52, %v599_v47  ;;  %v1581_v53 = vpop.f32.mrb[13].mxu1 }
 0x185   : > { %v715_v54 = vpop.f32.mrb[14].mxu1 }
 0x186   : > { %v724_v55 = vadd.f32 %v715_v54, %v602_v50  ;;  %v1582_v56 = vpop.f32.mrb[15].mxu1 }
 0x18b   : > { %v834_v57 = vpop.f32.mrb[16].mxu1 }
 0x18c   : > { %v843_v58 = vadd.f32 %v834_v57, %v721_v5  ;;  %v1587_v59 = vpop.f32.mrb[17].mxu1 }
 0x18d   : > { %v837_v60 = vpop.f32.mrb[18].mxu1 }
 0x18e   : > { %v846_v61 = vadd.f32 %v837_v60, %v724_v55  ;;  %v1588_v62 = vpop.f32.mrb[19].mxu1 }
 0x193   : > { %v956_v63 = vpop.f32.mrb[20].mxu1 }
 0x194   : > { %v965_v0 = vadd.f32 %v956_v63, %v843_v58  ;;  %v1593_v1 = vpop.f32.mrb[21].mxu1 }
 0x195   : > { %v959_v2 = vpop.f32.mrb[22].mxu1 }
 0x196   : > { %v968_v3 = vadd.f32 %v959_v2, %v846_v61  ;;  %v1594_v4 = vpop.f32.mrb[23].mxu1 }
 0x19b   : > { %v1078_v6 = vpop.f32.mrb[24].mxu1 }
 0x19c   : > { %v1087_v7 = vadd.f32 %v1078_v6, %v965_v0  ;;  %v1599_v8 = vpop.f32.mrb[25].mxu1 }
 0x19d   : > { %v1081_v9 = vpop.f32.mrb[26].mxu1 }
 0x19e   : > { %v1090_v11 = vadd.f32 %v1081_v9, %v968_v3  ;;  %v1600_v12 = vpop.f32.mrb[27].mxu1 }
 0x1a3   : > { %v1200_v13 = vpop.f32.mrb[28].mxu1 }
 0x1a4   : > { %v1209_v14 = vadd.f32 %v1200_v13, %v1087_v7  ;;  %v1605_v15 = vpop.f32.mrb[29].mxu1 }
 0x1a5   : > { %v1203_v16 = vpop.f32.mrb[30].mxu1 }
 0x1a6   : > { %v1212_v17 = vadd.f32 %v1203_v16, %v1090_v11  ;;  %v1606_v18 = vpop.f32.mrb[31].mxu1 }
 0x1ab   : > { %v1322_v19 = vpop.f32.mrb[32].mxu1 }
 0x1ac   : > { %v1331_v21 = vadd.f32 %v1322_v19, %v1209_v14  ;;  %v1611_v22 = vpop.f32.mrb[33].mxu1 }
 0x1ad   : > { %v1325_v23 = vpop.f32.mrb[34].mxu1 }
 0x1ae   : > { %v1334_v25 = vadd.f32 %v1325_v23, %v1212_v17  ;;  %v1349_v26 = vadd.f32 %v1340_v20, %v1331_v21  ;;  %v1612_v27 = vpop.f32.mrb[35].mxu1 }
 0x1b0   : > { %1355 = vst [vmem:[%s238_s30 + $0x10] sm:$0xff] %v1349_v26  ;;  %v1352_v28 = vadd.f32 %v1345_v24, %v1334_v25 }
 0x1b2   : > { %1358 = vst [vmem:[%s238_s30 + $0x28] sm:$0xff] %v1352_v28 }
 0x1c3   : > { %v1279_v29 = vpop.f32.mrb[0].mxu0 }
 0x1c4   : > { %v1347_v30 = vadd.f32 %v1340_v20, %v1279_v29  ;;  %v1281_v31 = vpop.f32.mrb[1].mxu0 }
 0x1c5   : > { %v1348_v32 = vadd.f32 %v1340_v20, %v1281_v31  ;;  %v1283_v33 = vpop.f32.mrb[2].mxu0 }
 0x1c6   : > { %1353 = vst [vmem:[%s238_s30] sm:$0xff] %v1347_v30  ;;  %v1350_v10 = vadd.f32 %v1345_v24, %v1283_v33  ;;  %v1285_v34 = vpop.f32.mrb[3].mxu0 }
 0x1c7   : > { %1354 = vst [vmem:[%s238_s30 + $0x8] sm:$0xff] %v1348_v32  ;;  %v1351_v35 = vadd.f32 %v1345_v24, %v1285_v34 }
 0x1c8   : > { %1356 = vst [vmem:[%s238_s30 + $0x18] sm:$0xff] %v1350_v10 }
 0x1c9   : > { %1357 = vst [vmem:[%s238_s30 + $0x20] sm:$0xff] %v1351_v35 }
 0x1ca PF: > { %s13_s14 = sadd.s32 1, %s1716_s14   ;;  %s1957_s12 = smov %s1712_s13 }
 0x1cb   : > { %p10_p5 = scmp.ge.s32.totalorder %s13_s14, 4   ;;  %s1958_s13 = smov %s1960_s15 }
 0x1cd   :  { %12 = sbr.rel (!%p10_p5) target bundleno = 2 (0x2), region = 76 }

</bundles_post_ra>
